<compile_context>
chip_gen: v7x
topology: tpu7x:2x2x1
jax: 0.10.0
libtpu: 0.0.40
codegen_flags: <defaults>
</compile_context>

<pallas_src>
import functools

import jax
import jax.numpy as jnp
from jax.experimental import pallas as pl
from jax.experimental.pallas import tpu as pltpu

_LANES = 128
_MAX_BLOCK_ROWS = 1024     # 1024 x 128 f32 = 512 KiB per input per grid step
_NUM_CORE_SPLIT = 2        # outer "parallel" axis (megacore split on v7x)
_LOG2 = 0.6931471805599453


def _logcosh_kernel(p_ref, t_ref, out_ref, acc_ref, *,
                    n, block_rows, inner_steps, apply_mask):
    c = pl.program_id(0)   # core-split axis ("parallel")
    i = pl.program_id(1)   # reduction axis ("arbitrary")

    @pl.when(i == 0)
    def _():
        acc_ref[...] = jnp.zeros_like(acc_ref)

    diff = (p_ref[...].astype(jnp.float32)
            - t_ref[...].astype(jnp.float32)) + jnp.float32(1e-12)
    # Numerically stable log(cosh(x)) = |x| + log1p(exp(-2|x|)) - log(2)
    ax = jnp.abs(diff)
    lc = ax + jnp.log1p(jnp.exp(-2.0 * ax)) - jnp.float32(_LOG2)

    if apply_mask:
        # Zero the padded tail (global flat index >= n). Only compiled in
        # when the input actually required padding.
        row_ids = jax.lax.broadcasted_iota(jnp.int32, lc.shape, 0)
        lane_ids = jax.lax.broadcasted_iota(jnp.int32, lc.shape, 1)
        base_row = (c * inner_steps + i) * block_rows
        flat_idx = (base_row + row_ids) * _LANES + lane_ids
        lc = jnp.where(flat_idx < n, lc, jnp.float32(0.0))

    acc_ref[...] += lc     # pure VPU elementwise accumulate

    @pl.when(i == inner_steps - 1)
    def _():
        # Deferred reduction, once per core: fold (block_rows,128) -> (8,128).
        folded = jnp.sum(acc_ref[...].reshape(-1, 8, _LANES), axis=0)
        out_ref[...] = folded[None, :, :]


def log_cosh_loss(predictions, targets):
    """Pallas implementation of mean(log(cosh(pred - target + 1e-12)))."""
    assert predictions.shape == targets.shape
    n = predictions.size

    # Keep the input dtype on the wire (cast happens in-kernel); no mask array.
    flat_p = predictions.reshape(-1)
    flat_t = targets.reshape(-1)

    total_rows = pl.cdiv(n, _LANES)
    rows_per_core = ((pl.cdiv(total_rows, _NUM_CORE_SPLIT) + 7) // 8) * 8
    block_rows = min(_MAX_BLOCK_ROWS, rows_per_core)
    inner_steps = pl.cdiv(rows_per_core, block_rows)
    rows_per_core = inner_steps * block_rows
    padded_rows = _NUM_CORE_SPLIT * rows_per_core
    padded = padded_rows * _LANES

    pad = padded - n
    if pad:
        flat_p = jnp.pad(flat_p, (0, pad))
        flat_t = jnp.pad(flat_t, (0, pad))

    p2 = flat_p.reshape(padded_rows, _LANES)
    t2 = flat_t.reshape(padded_rows, _LANES)

    kernel = functools.partial(
        _logcosh_kernel, n=n, block_rows=block_rows,
        inner_steps=inner_steps, apply_mask=(pad != 0))

    in_spec = pl.BlockSpec((block_rows, _LANES),
                           lambda c, i: (c * inner_steps + i, 0))

    partials = pl.pallas_call(
        kernel,
        out_shape=jax.ShapeDtypeStruct((_NUM_CORE_SPLIT, 8, _LANES),
                                       jnp.float32),
        grid_spec=pltpu.PrefetchScalarGridSpec(
            num_scalar_prefetch=0,
            grid=(_NUM_CORE_SPLIT, inner_steps),
            in_specs=[in_spec, in_spec],
            out_specs=pl.BlockSpec((1, 8, _LANES), lambda c, i: (c, 0, 0)),
            scratch_shapes=[pltpu.VMEM((block_rows, _LANES), jnp.float32)],
        ),
        compiler_params=pltpu.CompilerParams(
            dimension_semantics=("parallel", "arbitrary")),
    )(p2, t2)

    # Tiny final combine (2*8*128 f32) + mean scaling in the wrapper.
    return jnp.sum(partials) * jnp.float32(1.0 / n)


def _reference(predictions, targets):
    diff = predictions - targets
    return jnp.mean(jnp.log(jnp.cosh(diff + 1e-12)))


if __name__ == "__main__":
    key = jax.random.PRNGKey(0)

    # Case 1: NCHW-like input, divides evenly into the tiling (no padding).
    kp, kt, key = jax.random.split(key, 3)
    shape = (2, 4, 16, 16)
    predictions = jax.random.normal(kp, shape, dtype=jnp.float32)
    targets = jax.random.normal(kt, shape, dtype=jnp.float32)
    loss = jax.block_until_ready(log_cosh_loss(predictions, targets))
    ref = _reference(predictions, targets)
    assert jnp.allclose(loss, ref, rtol=1e-5, atol=1e-6), (loss, ref)

    # Case 2: ragged size exercising the in-kernel tail mask (padding path).
    kp2, kt2 = jax.random.split(key)
    shape2 = (3, 5, 7, 11)
    p2 = jax.random.normal(kp2, shape2, dtype=jnp.float32)
    t2 = jax.random.normal(kt2, shape2, dtype=jnp.float32)
    loss2 = jax.block_until_ready(log_cosh_loss(p2, t2))
    ref2 = _reference(p2, t2)
    assert jnp.allclose(loss2, ref2, rtol=1e-5, atol=1e-6), (loss2, ref2)

    print("KERNEL_OK")
</pallas_src>

<mosaic_0001>
module attributes {stable_mosaic.version = 11 : i64} {
  func.func @_logcosh_kernel(%arg0: i32, %arg1: i32, %arg2: memref<8x128xf32, #tpu.memory_space<vmem>>, %arg3: memref<8x128xf32, #tpu.memory_space<vmem>>, %arg4: memref<1x8x128xf32, #tpu.memory_space<vmem>>, %arg5: memref<8x128xf32, #tpu.memory_space<vmem>>) attributes {dimension_semantics = [#tpu.dimension_semantics<parallel>, #tpu.dimension_semantics<arbitrary>], iteration_bounds = array<i64: 2, 1>, scalar_prefetch = 0 : i64, scratch_operands = 1 : i64, tpu.core_type = #tpu.core_type<tc>, window_params = [{transform_indices = @transform_0, window_bounds = array<i64: 8, 128>}, {transform_indices = @transform_1, window_bounds = array<i64: 8, 128>}, {transform_indices = @transform_2, window_bounds = array<i64: 1, 8, 128>}]} {
    %c0_i32 = arith.constant 0 : i32
    %0 = arith.cmpi eq, %arg1, %c0_i32 : i32
    %1 = arith.extui %0 : i1 to i32
    %c0_i32_0 = arith.constant 0 : i32
    %2 = arith.cmpi ne, %1, %c0_i32_0 : i32
    scf.if %2 {
      %cst_12 = arith.constant 0.000000e+00 : f32
      %22 = vector.broadcast %cst_12 : f32 to vector<8x128xf32>
      %c0_13 = arith.constant 0 : index
      %c0_14 = arith.constant 0 : index
      %23 = vector.load %arg5[%c0_13, %c0_14] : memref<8x128xf32, #tpu.memory_space<vmem>>, vector<8x128xf32>
      tpu.vector_store %arg5[%c0_13, %c0_14], %22 {strides = array<i32>} : memref<8x128xf32, #tpu.memory_space<vmem>>, vector<8x128xf32>,
    } else {
    }
    %c0 = arith.constant 0 : index
    %c0_1 = arith.constant 0 : index
    %3 = vector.load %arg2[%c0, %c0_1] : memref<8x128xf32, #tpu.memory_space<vmem>>, vector<8x128xf32>
    %c0_2 = arith.constant 0 : index
    %c0_3 = arith.constant 0 : index
    %4 = vector.load %arg3[%c0_2, %c0_3] : memref<8x128xf32, #tpu.memory_space<vmem>>, vector<8x128xf32>
    %5 = arith.subf %3, %4 : vector<8x128xf32>
    %cst = arith.constant 9.99999996E-13 : f32
    %6 = vector.broadcast %cst : f32 to vector<8x128xf32>
    %7 = arith.addf %5, %6 : vector<8x128xf32>
    %8 = math.absf %7 : vector<8x128xf32>
    %cst_4 = arith.constant -2.000000e+00 : f32
    %9 = vector.broadcast %cst_4 : f32 to vector<8x128xf32>
    %10 = arith.mulf %9, %8 : vector<8x128xf32>
    %11 = math.exp %10 : vector<8x128xf32>
    %12 = math.log1p %11 : vector<8x128xf32>
    %13 = arith.addf %8, %12 : vector<8x128xf32>
    %cst_5 = arith.constant 0.693147182 : f32
    %14 = vector.broadcast %cst_5 : f32 to vector<8x128xf32>
    %15 = arith.subf %13, %14 : vector<8x128xf32>
    %c0_6 = arith.constant 0 : index
    %c0_7 = arith.constant 0 : index
    %16 = vector.load %arg5[%c0_6, %c0_7] : memref<8x128xf32, #tpu.memory_space<vmem>>, vector<8x128xf32>
    %17 = arith.addf %16, %15 : vector<8x128xf32>
    %c0_8 = arith.constant 0 : index
    %c0_9 = arith.constant 0 : index
    %18 = vector.load %arg5[%c0_8, %c0_9] : memref<8x128xf32, #tpu.memory_space<vmem>>, vector<8x128xf32>
    tpu.vector_store %arg5[%c0_8, %c0_9], %17 {strides = array<i32>} : memref<8x128xf32, #tpu.memory_space<vmem>>, vector<8x128xf32>,
    %c0_i32_10 = arith.constant 0 : i32
    %19 = arith.cmpi eq, %arg1, %c0_i32_10 : i32
    %20 = arith.extui %19 : i1 to i32
    %c0_i32_11 = arith.constant 0 : i32
    %21 = arith.cmpi ne, %20, %c0_i32_11 : i32
    scf.if %21 {
      %c0_12 = arith.constant 0 : index
      %c0_13 = arith.constant 0 : index
      %22 = vector.load %arg5[%c0_12, %c0_13] : memref<8x128xf32, #tpu.memory_space<vmem>>, vector<8x128xf32>
      %23 = vector.shape_cast %22 : vector<8x128xf32> to vector<1x8x128xf32>
      %cst_14 = arith.constant dense<0.000000e+00> : vector<8x128xf32>
      %24 = vector.multi_reduction <add>, %23, %cst_14 [0] : vector<1x8x128xf32> to vector<8x128xf32>
      %25 = vector.shape_cast %24 : vector<8x128xf32> to vector<1x8x128xf32>
      %c0_15 = arith.constant 0 : index
      %c0_16 = arith.constant 0 : index
      %c0_17 = arith.constant 0 : index
      %26 = vector.load %arg4[%c0_15, %c0_16, %c0_17] : memref<1x8x128xf32, #tpu.memory_space<vmem>>, vector<1x8x128xf32>
      tpu.vector_store %arg4[%c0_15, %c0_16, %c0_17], %25 {strides = array<i32>} : memref<1x8x128xf32, #tpu.memory_space<vmem>>, vector<1x8x128xf32>,
    } else {
    }
    return
  }
  func.func @transform_0(%arg0: i32, %arg1: i32) -> (i32, i32) {
    %c1_i32 = arith.constant 1 : i32
    %0 = arith.muli %arg0, %c1_i32 : i32
    %1 = arith.addi %0, %arg1 : i32
    %c0_i32 = arith.constant 0 : i32
    %c0_i32_0 = arith.constant 0 : i32
    return %1, %c0_i32 : i32, i32
  }
  func.func @transform_1(%arg0: i32, %arg1: i32) -> (i32, i32) {
    %c1_i32 = arith.constant 1 : i32
    %0 = arith.muli %arg0, %c1_i32 : i32
    %1 = arith.addi %0, %arg1 : i32
    %c0_i32 = arith.constant 0 : i32
    %c0_i32_0 = arith.constant 0 : i32
    return %1, %c0_i32 : i32, i32
  }
  func.func @transform_2(%arg0: i32, %arg1: i32) -> (i32, i32, i32) {
    %c0_i32 = arith.constant 0 : i32
    %c0_i32_0 = arith.constant 0 : i32
    %c0_i32_1 = arith.constant 0 : i32
    return %arg0, %c0_i32, %c0_i32_0 : i32, i32, i32
  }
}

</mosaic_0001>

<bundles_post_ra>
// kernel: tpu_custom_call.1
= control target key start
LH: loop header
LB: loop body
LE: loop exit
PB: predicated region body
PF: predicated region fallthrough
CT: control target
= control target key end

     0   :  { %7 = vsyncpa [#allocation4], 0  ;;  %s845_s0 = inlined_call_operand.hbm [shape: f32[16,128], index: 0, kind: input, shape index: {}]   ;;  %s846_s1 = inlined_call_operand.hbm [shape: f32[16,128], index: 1, kind: input, shape index: {}]   ;;  %s847_s2 = inlined_call_operand.hbm [shape: f32[2,8,128], index: 2, kind: output, shape index: {}]  }
   0x1   :  { %9 = vsyncpa [#allocation4 + $0x1], 0 }
   0x2   :  { %10 = vsyncpa [#allocation7], 0 }
   0x3   :  { %12 = vsyncpa [#allocation7 + $0x1], 0 }
   0x4   :  { %13 = vsyncpa [#allocation5], 0 }
   0x5   :  { %15 = vsyncpa [#allocation5 + $0x1], 0  ;;  %s620_s9 = smov 0   ;;  %s622_s10 = smov 0  }
   0x6   :  { %s624_s11 = smov 0   ;;  %s626_s12 = smov 0  }
   0x7   :  { %s628_s13 = smov 0   ;;  %s630_s14 = smov 0  }
   0x8 LB: > { %s366_s15 = sadd.s32 4294967295, %s600_s14   ;;  %s367_s16 = sadd.s32 4294967294, %s600_s14   ;;  %s600_s14 = sphi %s630_s14, %s21_s14   ;;  %s596_s13 = sphi %s628_s13, %s867_s13   ;;  %s592_s12 = sphi %s626_s12, %s866_s12   ;;  %s588_s11 = sphi %s624_s11, %s865_s11   ;;  %s584_s10 = sphi %s622_s10, %s864_s10   ;;  %s580_s9 = sphi %s620_s9, %s863_s9  }
   0x9   : > { %s33_s17 = sadd.s32 1, %s596_s13  ;;  %s42_s18 = sadd.s32 1, %s588_s11 }
   0xa   : > { %p35_p0 = scmp.ge.s32.totalorder %s33_s17, 2  ;;  %p49_p1 = scmp.ne.s32.totalorder %s588_s11, %s584_s10 }
   0xb   : > { %p50_p2 = scmp.eq.s32.totalorder %s600_s14, 0  ;;  %p55_p3 = scmp.ne.s32.totalorder %s584_s10, %s580_s9 }
   0xc   : > { %s869_s17 = smov (%p35_p0, %s33_s17), 0  ;;  %p56_p5 = scmp.eq.s32.totalorder %s366_s15, 0 }
   0xd   : > { %p661_p4 = por %p50_p2, %p49_p1  ;;  %s39_s20 = ssub.s32 %s596_s13, %s869_s17 }
   0xe   : > { %p107_p6 = scmp.eq.s32.totalorder %s366_s15, 1  ;;  %p40_p7 = scmp.eq.s32.totalorder %s39_s20, 0 }
   0xf   : > { %p667_p8 = por %p56_p5, %p55_p3  ;;  %p113_p10 = scmp.eq.s32.totalorder %s367_s16, 1 }
  0x10   : > { %p671_p9 = por %p107_p6, %p49_p1  ;;  %p400_p13 = scmp.lt.s32.totalorder %s600_s14, 2 }
  0x11   : > { %s851_s21 = scalar_select %p667_p8, 1, 0 }
  0x12   : > { %s852_s22 = scalar_select %p671_p9, 1, 0 }
  0x13   : > { %s676_s23 = scalar_select %p40_p7, %s588_s11, %s42_s18  }
  0x14   : > { %p678_p11 = por %p113_p10, %p55_p3  ;;  %s685_s25 = sand.u32 1, %s588_s11  }
  0x15   : > { %s370_s26 = sshll.u32 %s685_s25, 3  ;;  %s371_s27 = sshll.u32 %s596_s13, 7 }
  0x16   : > { %s853_s24 = scalar_select %p678_p11, 1, 0 }
  0x17   : > { %s694_s30 = scalar_lea.hbm %s845_s0, %s371_s27  ;;  %s137_s3 = scalar_lea.vmem [#allocation3], %s370_s26 }
  0x18   : > { %s145_s4 = sshll.u32 %s137_s3, 4  ;;  %p702_p0 = pnand %p400_p13, %p661_p4  ;;  %s698_s4 = int_to_ptr.vmem [resolvable:$true] %s145_s4 }
  0x19   : > { %s134_s6 = scalar_lea.sflag [#allocation4], %s685_s25  ;;  %s454_s7 = scalar_lea.hbm %s694_s30, 128 }
  0x1a   : > { %p455_p3 = scmp.ne.s32.totalorder %s694_s30, %s454_s7  ;;  %p456_p5 = pneg %p702_p0 }
  0x1b   : > { %s459_s16 = scalar_lea.hbm %s845_s0, 256  ;;  %p460_p4 = scmp.lt.u32.totalorder %s694_s30, %s845_s0 }
  0x1c   : > { %p457_p6 = pnand %p456_p5, %p455_p3  ;;  %p461_p10 = scmp.lt.u32.totalorder %s459_s16, %s454_s7 }
  0x1d   : > { %p463_p12 = scmp.lt.u32.totalorder %s454_s7, %s694_s30 }
  0x1e   : > { %p458_p7 = pneg %p457_p6  ;;  %p462_p13 = por %p461_p10, %p460_p4 }
  0x20   : > { %p464_p1 = por %p463_p12, %p462_p13 }
  0x22   : > { %p465_p2 = pnand %p464_p1, %p458_p7 }
  0x24   : > { %468 = shalt.err (!%p465_p2)
}
  0x25   : > { %s469_s20 = scalar_lea.vmem %s698_s4, 128  ;;  %s602_s28 = smov [#allocation3]  }
  0x26   : > { %p470_p3 = scmp.ne.s32.totalorder %s698_s4, %s469_s20  ;;  %s474_s29 = sshll.u32 %s602_s28, 4  ;;  %s475_s29 = int_to_ptr.vmem [resolvable:$false] %s474_s29 }
  0x27   : > { %s476_s3 = scalar_lea.vmem %s475_s29, 256  ;;  %p477_p9 = scmp.lt.s32.totalorder %s698_s4, %s475_s29 }
  0x28   : > { %p472_p6 = pnand %p470_p3, %p456_p5  ;;  %p478_p4 = scmp.lt.s32.totalorder %s476_s3, %s469_s20 }
  0x2a   : > { %p473_p11 = pneg %p472_p6  ;;  %p479_p10 = por %p478_p4, %p477_p9 }
  0x2c   : > { %p480_p12 = pnand %p479_p10, %p473_p11 }
  0x2e   : > { %483 = shalt.err (!%p480_p12)
}
  0x2f   : > { %392 = dma.hbm_to_vmem [thread:$0]  (!%p702_p0), %s694_s30, 128, %s698_s4, %s134_s6  }
  0x30   : > { %p855_p1 = scmp.lt.s32.totalorder %s600_s14, 3  ;;  %p856_p2 = scmp.ge.s32.totalorder %s600_s14, 1 }
  0x31   : > { %s747_s16 = scalar_lea.hbm %s846_s1, %s371_s27  ;;  %s156_s18 = scalar_lea.vmem [#allocation6], %s370_s26 }
  0x32   : > { %p738_p7 = pnand %p856_p2, %p855_p1  ;;  %s164_s19 = sshll.u32 %s156_s18, 4  ;;  %s165_s19 = int_to_ptr.vmem [resolvable:$true] %s164_s19 }
  0x33   : > { %s153_s30 = scalar_lea.sflag [#allocation7], %s685_s25  ;;  %s484_s4 = scalar_lea.hbm %s747_s16, 128 }
  0x34   : > { %s857_s7 = scalar_select %p738_p7, 1, 0 }
  0x35   : > { %p485_p9 = scmp.ne.s32.totalorder %s747_s16, %s484_s4  ;;  %s489_s27 = scalar_lea.hbm %s846_s1, 256 }
  0x36   : > { %p490_p3 = scmp.lt.u32.totalorder %s747_s16, %s846_s1  ;;  %p491_p6 = scmp.lt.u32.totalorder %s489_s27, %s484_s4 }
  0x37   : > { %p487_p11 = pnand %p485_p9, %p456_p5  ;;  %p493_p10 = scmp.lt.u32.totalorder %s484_s4, %s747_s16 }
  0x38   : > { %p492_p4 = por %p491_p6, %p490_p3 }
  0x39   : > { %p488_p13 = pneg %p487_p11 }
  0x3a   : > { %p494_p12 = por %p493_p10, %p492_p4 }
  0x3c   : > { %p495_p1 = pnand %p494_p12, %p488_p13 }
  0x3e   : > { %498 = shalt.err (!%p495_p1)
}
  0x3f   : > { %s499_s25 = scalar_lea.vmem %s165_s19, 128  ;;  %s603_s26 = smov [#allocation6]  }
  0x40   : > { %p500_p2 = scmp.ne.s32.totalorder %s165_s19, %s499_s25  ;;  %s504_s3 = sshll.u32 %s603_s26, 4  ;;  %s505_s3 = int_to_ptr.vmem [resolvable:$false] %s504_s3 }
  0x41   : > { %s506_s8 = scalar_lea.vmem %s505_s3, 256  ;;  %p507_p8 = scmp.lt.s32.totalorder %s165_s19, %s505_s3 }
  0x42   : > { %p502_p9 = pnand %p500_p2, %p456_p5  ;;  %p508_p7 = scmp.lt.s32.totalorder %s506_s8, %s499_s25 }
  0x44   : > { %p503_p11 = pneg %p502_p9  ;;  %p509_p3 = por %p508_p7, %p507_p8 }
  0x46   : > { %p510_p6 = pnand %p509_p3, %p503_p11 }
  0x48   : > { %513 = shalt.err (!%p510_p6)
}
  0x49   : > { %395 = dma.hbm_to_vmem [thread:$0]  (!%p702_p0), %s747_s16, 128, %s165_s19, %s153_s30  }
  0x4a   : > { %p858_p13 = scmp.ne.s32.totalorder %s857_s7, 0 }
  0x4b   : > { %s774_s15 = sand.u32 (!%p858_p13), 1, %s584_s10   ;;  %p859_p8 = scmp.ne.s32.totalorder (!%p858_p13), %s851_s21, 0 }
  0x4c   : > { %173 = sbr.rel (%p858_p13) target bundleno = 142 (0x8e), region = 28  ;;  %s777_s18 = sshll.u32 (!%p858_p13), %s774_s15, 3 }
  0x4d   : > { %s176_s4 = scalar_lea.sflag (!%p858_p13), [#allocation4], %s774_s15  ;;  %s179_s6 = scalar_lea.vmem (!%p858_p13), [#allocation3], %s777_s18 }
  0x53   : > { %567 = dma.done.wait (%p859_p8), %s176_s4, 128  }
  0x54   : > { %569 = vsyncadd (%p859_p8), %s176_s4, 4294967168  ;;  %s185_s5 = scalar_lea.sflag [#allocation7], %s774_s15  ;;  %s188_s7 = scalar_lea.vmem [#allocation6], %s777_s18 }
  0x55   : > { %571 = dma.done.wait (%p859_p8), %s185_s5, 128  }
  0x56   : > { %573 = vsyncadd (%p859_p8), %s185_s5, 4294967168  ;;  %v221_v0 = vld [vmem:[%s179_s6] sm:$0xff]  ;;  %v222_v1 = vld [vmem:[%s188_s7] sm:$0xff]  ;;  %s213_s21 = scalar_lea.vmem [#allocation8], %s777_s18  ;;  %s380_s19 = sshll.u32 %s592_s12, 7 }
  0x57   : > { %v223_v2 = vsub.f32 %v221_v0, %v222_v1  ;;  %s263_s16 = sshll.u32 %s213_s21, 4  ;;  %s798_s27 = scalar_lea.hbm %s847_s2, %s380_s19  ;;  %s793_s16 = int_to_ptr.vmem [resolvable:$true] %s263_s16 }
  0x58   : > { %s250_s28 = scalar_lea.sflag [#allocation5], %s774_s15  ;;  %s514_s29 = scalar_lea.vmem %s793_s16, 128 }
  0x59   : > { %v224_v3 = vadd.f32 1e-12, %v223_v2  ;;  %p515_p0 = scmp.ne.s32.totalorder %s793_s16, %s514_s29  ;;  %p860_p5 = scmp.ne.s32.totalorder %s852_s22, 0 }
  0x5a   : > { %s604_s12 = smov [#allocation8]  }
  0x5b   : > { %v225_v4 = vand.u32 2147483647, %v224_v3  ;;  %p516_p7 = pnand %p515_p0, %p860_p5  ;;  %s518_s25 = sshll.u32 %s604_s12, 4  ;;  %s519_s25 = int_to_ptr.vmem [resolvable:$false] %s518_s25 }
  0x5c   : > { %s520_s26 = scalar_lea.vmem %s519_s25, 256  ;;  %p521_p10 = scmp.lt.s32.totalorder %s793_s16, %s519_s25 }
  0x5d   : > { %v226_v5 = vmul.f32 -2.0, %v225_v4  ;;  %p517_p4 = pneg %p516_p7  ;;  %p522_p12 = scmp.lt.s32.totalorder %s520_s26, %s514_s29 }
  0x5f   : > { %v227_v6 = vmul.f32 1.442695, %v226_v5  ;;  %p523_p1 = por %p522_p12, %p521_p10 }
  0x61   : > { %450 = vpow2.f32 %v227_v6  ;;  %p524_p2 = pnand %p523_p1, %p517_p4 }
  0x6b   : > { %v451_v7 = vpop.eup %450 }
  0x6c   : > { %v229_v8 = vadd.f32 1.0, %v451_v7  ;;  %v232_v9 = vmul.f32 -0.5, %v451_v7  ;;  %v235_v11 = vand.u32 2147483647, %v451_v7 }
  0x6e   : > { %452 = vlog2.f32 %v229_v8  ;;  %v233_v10 = vadd.f32 1.0, %v232_v9  ;;  %vm236_vm0 = vcmp.lt.f32.partialorder %v235_v11, 0.0004427343 }
  0x70   : > { %v234_v12 = vmul.f32 %v451_v7, %v233_v10 }
  0x78   : > { %v453_v13 = vpop.eup %452 }
  0x79   : > { %v231_v14 = vmul.f32 0.6931472, %v453_v13 }
  0x7b   : > { %v237_v15 = vsel %vm236_vm0, %v234_v12, %v231_v14 }
  0x7c   : > { %v238_v16 = vadd.f32 %v237_v15, %v225_v4 }
  0x7e   : > { %v378_v17 = vadd.f32 -0.6931472, %v238_v16 }
  0x80   : > { %248 = vst [vmem:[%s213_s21] sm:$0xff] %v378_v17 }
  0x81   : > { %527 = shalt.err (!%p524_p2)
}
  0x82   : > { %s528_s3 = scalar_lea.hbm %s798_s27, 128  ;;  %s532_s18 = scalar_lea.hbm %s847_s2, 256 }
  0x83   : > { %p529_p9 = scmp.ne.s32.totalorder %s798_s27, %s528_s3  ;;  %p533_p6 = scmp.lt.u32.totalorder %s798_s27, %s847_s2 }
  0x84   : > { %p534_p13 = scmp.lt.u32.totalorder %s532_s18, %s528_s3  ;;  %p536_p0 = scmp.lt.u32.totalorder %s528_s3, %s798_s27 }
  0x85   : > { %p530_p11 = pnand %p529_p9, %p860_p5 }
  0x86   : > { %p535_p8 = por %p534_p13, %p533_p6 }
  0x87   : > { %p531_p3 = pneg %p530_p11 }
  0x88   : > { %p537_p7 = por %p536_p0, %p535_p8 }
  0x8a   : > { %p538_p4 = pnand %p537_p7, %p531_p3 }
  0x8c   : > { %541 = shalt.err (!%p538_p4)
}
  0x8d   : > { %387 = dma.vmem_to_hbm [thread:$0]  (%p860_p5), %s793_s16, 128, %s798_s27, %s250_s28  }
  0x8e PF: > { %s275_s5 = sand.u32 1, %s580_s9   ;;  %p861_p10 = scmp.ne.s32.totalorder %s853_s24, 0 }
  0x8f   : > { %p862_p12 = scmp.ge.s32.totalorder %s600_s14, 2  ;;  %s276_s7 = scalar_lea.sflag [#allocation5], %s275_s5 }
  0x91   : > { %p397_p1 = pnand %p862_p12, %p861_p10 }
  0x93   : > { %575 = dma.done.wait (!%p397_p1), %s276_s7, 128  }
  0x94   : > { %577 = vsyncadd (!%p397_p1), %s276_s7, 4294967168  ;;  %s21_s14 = sadd.s32 1, %s600_s14   ;;  %s863_s9 = smov %s584_s10 }
  0x95   : > { %p18_p2 = scmp.ge.s32.totalorder %s21_s14, 4   ;;  %s864_s10 = smov %s588_s11 }
  0x96   : > { %s865_s11 = smov %s676_s23  ;;  %s866_s12 = smov %s596_s13 }
  0x97   : > { %s867_s13 = smov %s869_s17  ;;  %20 = sbr.rel (!%p18_p2) target bundleno = 8 (0x8), region = 94 }
  0x9e   :  { %281 = vsyncpa [#allocation4], 1 }
  0x9f   :  { %283 = vsyncpa [#allocation4 + $0x1], 1 }
  0xa0   :  { %284 = vsyncpa [#allocation7], 1 }
  0xa1   :  { %286 = vsyncpa [#allocation7 + $0x1], 1 }
  0xa2   :  { %287 = vsyncpa [#allocation5], 1 }
  0xa3   :  { %289 = vsyncpa [#allocation5 + $0x1], 1 }

</bundles_post_ra>
